<compile_context>
chip_gen: v7x
topology: tpu7x:2x2x1
jax: 0.10.0
libtpu: 0.0.40
codegen_flags: <defaults>
</compile_context>

<pallas_src>
import numpy as np
import jax
import jax.numpy as jnp
from jax.experimental import pallas as pl
from jax.experimental.pallas import tpu as pltpu

_MB = 1024 * 1024


# ---------------------------------------------------------------------------
# Host-side (numpy) fast FrFT -- faithful port of the Ozaktas algorithm used by
# torch_frft.frft, acting along the last axis.  Used only to build the transform
# matrix (cached) and as the correctness reference.
# ---------------------------------------------------------------------------
def _np_fconv(x, y):
    """Linear convolution along the last axis via zero-padded FFT."""
    n = x.shape[-1] + y.shape[-1] - 1
    p = 1 << (n - 1).bit_length()
    z = np.fft.ifft(np.fft.fft(x, n=p, axis=-1) * np.fft.fft(y, n=p, axis=-1), axis=-1)
    return z[..., :n]


def _np_sinc_interp2(f):
    """Sinc interpolation by 2x: (..., N) -> (..., 2N-1)."""
    N = f.shape[-1]
    y = np.zeros(f.shape[:-1] + (2 * N - 1,), dtype=np.complex128)
    y[..., ::2] = f
    snc = np.sinc(np.arange(-(2 * N - 3), 2 * N - 2) / 2.0)
    xint = _np_fconv(y, snc)
    return xint[..., 2 * N - 3: 4 * N - 4]


def _np_shifted_fft(f, sqrt_n, inverse=False):
    """fftshift-style permuted (i)FFT:  out[shft] = fft(f[shft]) / sqrt(N)."""
    N = f.shape[-1]
    g = np.roll(f, -(N // 2), axis=-1)
    h = np.fft.ifft(g, axis=-1) * sqrt_n if inverse else np.fft.fft(g, axis=-1) / sqrt_n
    return np.roll(h, N // 2, axis=-1)


def frft_np(fc, order):
    """Fast fractional Fourier transform along the last axis (complex128, host)."""
    fc = np.asarray(fc, np.complex128)
    N = fc.shape[-1]
    sqrt_n = float(np.sqrt(N))
    a = float(order) % 4.0

    # exact special cases
    if a == 0.0:
        return fc
    if a == 2.0:
        return np.flip(fc, axis=-1)
    if a == 1.0:
        return _np_shifted_fft(fc, sqrt_n, inverse=False)
    if a == 3.0:
        return _np_shifted_fft(fc, sqrt_n, inverse=True)

    # reduce order to the interval 0.5 < a < 1.5
    if a > 2.0:
        a -= 2.0
        fc = np.flip(fc, axis=-1)
    if a > 1.5:
        a -= 1.0
        fc = _np_shifted_fft(fc, sqrt_n, inverse=False)
    if a < 0.5:
        a += 1.0
        fc = _np_shifted_fft(fc, sqrt_n, inverse=True)

    alpha = a * np.pi / 2.0
    tana2 = np.tan(alpha / 2.0)
    sina = np.sin(alpha)

    zeros = np.zeros(fc.shape[:-1] + (N - 1,), dtype=np.complex128)
    f = np.concatenate([zeros, _np_sinc_interp2(fc), zeros], axis=-1)     # (..., 4N-3)

    n_idx = np.arange(-2 * N + 2, 2 * N - 1)
    chrp = np.exp(1j * (-np.pi / N * tana2 / 4.0) * n_idx ** 2)
    f = chrp * f                                                          # chirp pre-mult

    c = np.pi / N / sina / 4.0
    m_idx = np.arange(-(4 * N - 4), 4 * N - 3)
    e = np.exp(1j * c * m_idx ** 2)
    faf = _np_fconv(e, f)[..., 4 * N - 4: 8 * N - 7] * np.sqrt(c / np.pi)
    faf = chrp * faf                                                      # chirp post-mult
    phase = np.exp(-1j * (1.0 - a) * np.pi / 4.0)
    return phase * faf[..., N - 1: 3 * N - 2: 2]                          # decimate by 2


# ---------------------------------------------------------------------------
# Cached fused transform matrix: block-diagonal (k copies) of the (N, 2N)
# column-interleaved [re, im] FrFT matrix, zero-padded to c_pad lanes.
# ---------------------------------------------------------------------------
_MATRIX_CACHE = {}


def _round_up(v, m):
    return ((v + m - 1) // m) * m


def _fused_frft_matrix(N, order, k, c_pad, mat_dtype):
    key = (int(N), float(order), int(k), int(c_pad), np.dtype(mat_dtype).name)
    m = _MATRIX_CACHE.get(key)
    if m is None:
        M = frft_np(np.eye(N, dtype=np.complex128), float(order))    # rows = frft(e_row)
        inter = np.zeros((N, 2 * N), dtype=np.float64)
        inter[:, 0::2] = M.real                                       # [re0,im0,re1,im1,...]
        inter[:, 1::2] = M.imag
        fused = np.zeros((k * N, c_pad), dtype=np.float64)
        for j in range(k):                                            # block-diagonal packing
            fused[j * N:(j + 1) * N, 2 * N * j: 2 * N * (j + 1)] = inter
        m = jnp.asarray(fused.astype(np.float32), dtype=mat_dtype)
        _MATRIX_CACHE[key] = m
    return m


# ---------------------------------------------------------------------------
# Hardware-aware VMEM budget and TensorCore count.
# ---------------------------------------------------------------------------
_HW_CACHE = {}


def _hw_params():
    if "p" in _HW_CACHE:
        return _HW_CACHE["p"]
    vmem_cap = 0
    try:
        info = pltpu.get_tpu_info()
        for name in ("vmem_capacity_bytes", "vmem_bytes", "vmem_size_bytes"):
            v = getattr(info, name, None)
            if v:
                vmem_cap = int(v)
                break
    except Exception:
        vmem_cap = 0
    kind = ""
    try:
        kind = jax.devices()[0].device_kind.lower()
    except Exception:
        pass
    # v7x: 2 TensorCores/chip, 64 MiB VMEM per TC; v5e/v6e: 1 TC, 128 MiB VMEM.
    num_tc = 2 if ("v7" in kind or (0 < vmem_cap <= 64 * _MB)) else 1
    if vmem_cap >= 128 * _MB:
        budget, limit = 96 * _MB, 110 * _MB      # plenty idle on 128 MiB parts
    else:
        budget, limit = 40 * _MB, 48 * _MB       # safe on v7x 64 MiB / unknown hardware
    _HW_CACHE["p"] = (budget, limit, num_tc)
    return _HW_CACHE["p"]


_ROW_TILE_CAP = 512


def _choose_tiles(rows, K, c_pad, mat_itemsize, vmem_budget, num_tc):
    """Pick (tm, tn, col_steps, mat_bufs) under the VMEM budget."""
    # --- column tiling: keep the fused matrix within half the budget ----------
    mat_budget = max(vmem_budget // 2, 2 * _MB)
    if K * c_pad * mat_itemsize <= mat_budget:
        tn, col_steps, mat_bufs = c_pad, 1, 1            # fully resident, single-buffered
    else:
        mat_bufs = 2                                     # column-streamed -> double-buffered
        tn = 128                                         # 128 always divides c_pad
        for m in range(c_pad // 128, 0, -1):
            cand = 128 * m
            if c_pad % cand == 0 and mat_bufs * K * cand * mat_itemsize <= mat_budget:
                tn = cand
                break
        col_steps = c_pad // tn

    # --- row tiling: core-count aware step count -------------------------------
    if rows <= 16 or num_tc <= 1:
        n_steps = max(1, pl.cdiv(rows, _ROW_TILE_CAP))
    else:
        n_steps = _round_up(max(num_tc, pl.cdiv(rows, _ROW_TILE_CAP)), num_tc)
    tm = min(_round_up(pl.cdiv(rows, n_steps), 16), _ROW_TILE_CAP)

    def vmem_est(t):
        return (2 * t * K * 4                      # f32 x tile, double-buffered
                + 2 * t * tn * 4                   # f32 out tile, double-buffered
                + mat_bufs * K * tn * mat_itemsize)

    while tm > 16 and vmem_est(tm) > vmem_budget:
        tm = max(16, _round_up(tm // 2, 16))
    return tm, tn, col_steps, mat_bufs


# ---------------------------------------------------------------------------
# Pallas kernel: pure matmul-to-store.  x tile arrives in f32 and is cast to the
# matrix dtype in-kernel (VPU work hidden under DMA/MXU).
# ---------------------------------------------------------------------------
def _frft_matmul_kernel(x_ref, m_ref, y_ref):
    y_ref[...] = jnp.dot(x_ref[...].astype(m_ref.dtype), m_ref[...],
                         preferred_element_type=jnp.float32)


def _interleaved_to_complex(pairs_f32):
    """(..., 2) float32 [re, im] pairs -> (...) complex64."""
    try:
        # Free when XLA supports a complex bitcast target.
        return jax.lax.bitcast_convert_type(pairs_f32, jnp.complex64)
    except Exception:
        # Fallback: one fused op over contiguous interleaved pairs.
        return jax.lax.complex(pairs_f32[..., 0], pairs_f32[..., 1])


def frft_layer_forward(x, order, *, dim=-1, compute_dtype=jnp.bfloat16):
    if jnp.iscomplexobj(x):
        # TODO(synk): complex inputs need a second fused matmul for x_im.
        raise NotImplementedError("FrFTLayer Pallas kernel supports real inputs only")
    # TODO(synk): bf16 matrix error grows ~sqrt(N); pass compute_dtype=jnp.float32
    #             for large N if downstream accuracy matters.
    x = jnp.asarray(x, jnp.float32)
    x_moved = jnp.moveaxis(x, dim, -1)
    batch_shape = x_moved.shape[:-1]
    N = x_moved.shape[-1]
    R = int(np.prod(batch_shape)) if batch_shape else 1
    xf = x_moved.reshape(R, N)                         # stays f32; cast happens in-kernel

    # Small-N packing: k rows share the MXU K dimension via a block-diagonal matrix.
    k = max(1, min(128 // N, R)) if N < 128 else 1
    R_pad = _round_up(R, k)
    if R_pad != R:                                     # tiny pad only to a multiple of k
        xf = jnp.pad(xf, ((0, R_pad - R), (0, 0)))
    rows = R_pad // k
    K = k * N
    xf = xf.reshape(rows, K)

    c_pad = max(128, _round_up(2 * K, 128))            # lane-dense fused output width
    mat_itemsize = np.dtype(compute_dtype).itemsize
    vmem_budget, vmem_limit, num_tc = _hw_params()

    tm, tn, col_steps, _ = _choose_tiles(rows, K, c_pad, mat_itemsize, vmem_budget, num_tc)
    row_steps = pl.cdiv(rows, tm)                       # ragged last block handled by Pallas

    m_fused = _fused_frft_matrix(N, float(order), k, c_pad, compute_dtype)

    flops = 2 * rows * K * c_pad
    bytes_accessed = rows * K * 4 + K * c_pad * mat_itemsize + rows * c_pad * 4

    def _call(matrix_pipeline_mode):
        mat_kwargs = {}
        if matrix_pipeline_mode is not None:
            mat_kwargs["pipeline_mode"] = matrix_pipeline_mode
        grid_spec = pltpu.PrefetchScalarGridSpec(
            num_scalar_prefetch=0,
            grid=(row_steps, col_steps),
            in_specs=[
                pl.BlockSpec((tm, K), lambda i, j: (i, 0)),          # streamed rows of x
                pl.BlockSpec((K, tn), lambda i, j: (0, j), **mat_kwargs),  # fused matrix
            ],
            out_specs=pl.BlockSpec((tm, tn), lambda i, j: (i, j)),
        )
        return pl.pallas_call(
            _frft_matmul_kernel,
            out_shape=jax.ShapeDtypeStruct((rows, c_pad), jnp.float32),
            grid_spec=grid_spec,
            compiler_params=pltpu.CompilerParams(
                dimension_semantics=("parallel", "parallel"),
                vmem_limit_bytes=vmem_limit,
            ),
            cost_estimate=pl.CostEstimate(
                flops=int(flops), transcendentals=0, bytes_accessed=int(bytes_accessed)),
        )(xf, m_fused)

    if col_steps == 1:
        # Constant index map -> single-buffer the resident matrix (halves its VMEM).
        try:
            y_fused = _call(pl.Buffered(1))
        except Exception:
            y_fused = _call(None)
    else:
        y_fused = _call(None)

    # Epilogue: contiguous slice of the useful lanes, then assemble complex from
    # the interleaved [re, im] pairs (one fused pass, no strided re/im slices).
    y_pairs = y_fused[:, : 2 * K].reshape(rows, k, N, 2)
    yc = _interleaved_to_complex(y_pairs).reshape(R_pad, N)[:R]
    y = yc.reshape(batch_shape + (N,))
    return jnp.moveaxis(y, -1, dim)


class FrFTLayer:
    """JAX/Pallas equivalent of torch_frft.layer.FrFTLayer (forward only)."""

    def __init__(self, order: float = 1.0, *, dim: int = -1):
        # TODO(synk): `order` is a static host constant (matrix built on the host),
        #             so this forward is not differentiable w.r.t. order.
        self.order = float(order)          # plain float: no per-call device->host sync
        self.dim = dim

    def __repr__(self):
        return f"FrFTLayer(order={self.order}, dim={self.dim})"

    def __call__(self, x):
        return frft_layer_forward(x, self.order, dim=self.dim)


if __name__ == "__main__":
    key = jax.random.PRNGKey(0)
    x = jax.random.normal(key, (2, 4, 16, 16), dtype=jnp.float32)  # NCHW

    order = 0.75  # exercises the general chirp path (0.5 < a < 1.5)
    layer = FrFTLayer(order=order, dim=-1)

    y = jax.block_until_ready(layer(x))
    assert y.shape == x.shape and y.dtype == jnp.complex64

    N = x.shape[-1]
    x_np = np.asarray(x).reshape(-1, N)
    y_np = np.asarray(y).reshape(-1, N)

    # 1) Kernel exactness: same-precision host reference (bf16 operands, f32 accum).
    M = frft_np(np.eye(N, dtype=np.complex128), order)
    xq = np.asarray(jnp.asarray(x_np, jnp.bfloat16).astype(jnp.float32))
    mre_q = np.asarray(jnp.asarray(M.real, jnp.bfloat16).astype(jnp.float32))
    mim_q = np.asarray(jnp.asarray(M.imag, jnp.bfloat16).astype(jnp.float32))
    y_same = xq @ mre_q + 1j * (xq @ mim_q)
    err_kernel = float(np.max(np.abs(y_np - y_same)))
    assert err_kernel < 1e-3, f"kernel mismatch {err_kernel}"

    # 2) End-to-end fidelity vs the exact double-precision FrFT of the signals.
    y_true = frft_np(x_np.astype(np.complex128), order)
    err_true = float(np.max(np.abs(y_np.astype(np.complex128) - y_true)))
    assert err_true < 5e-2, f"bf16 FrFT error {err_true}"

    print("KERNEL_OK")
</pallas_src>

<mosaic_0001>
module attributes {stable_mosaic.version = 11 : i64} {
  func.func @_frft_matmul_kernel(%arg0: i32, %arg1: i32, %arg2: memref<16x128xf32, #tpu.memory_space<vmem>>, %arg3: memref<128x256xbf16, #tpu.memory_space<vmem>>, %arg4: memref<16x256xf32, #tpu.memory_space<vmem>>) attributes {dimension_semantics = [#tpu.dimension_semantics<parallel>, #tpu.dimension_semantics<parallel>], iteration_bounds = array<i64: 1, 1>, scalar_prefetch = 0 : i64, scratch_operands = 0 : i64, tpu.core_type = #tpu.core_type<tc>, window_params = [{transform_indices = @transform_0, window_bounds = array<i64: 16, 128>}, {pipeline_mode = #tpu.pipeline_mode<synchronous>, transform_indices = @transform_1, window_bounds = array<i64: 128, 256>}, {transform_indices = @transform_2, window_bounds = array<i64: 16, 256>}]} {
    %c0 = arith.constant 0 : index
    %c0_0 = arith.constant 0 : index
    %0 = vector.load %arg2[%c0, %c0_0] : memref<16x128xf32, #tpu.memory_space<vmem>>, vector<16x128xf32>
    %1 = arith.truncf %0 : vector<16x128xf32> to vector<16x128xbf16>
    %c0_1 = arith.constant 0 : index
    %c0_2 = arith.constant 0 : index
    %2 = vector.load %arg3[%c0_1, %c0_2] : memref<128x256xbf16, #tpu.memory_space<vmem>>, vector<128x256xbf16>
    %cst = arith.constant dense<0.000000e+00> : vector<16x256xf32>
    %3 = tpu.matmul %1, %2, %cst {dimension_numbers = #tpu.dot_dimension_numbers<[1], [0], [0], [1], [0, 0, 1, 1], [], []>} : vector<16x128xbf16>, vector<128x256xbf16>, vector<16x256xf32> -> vector<16x256xf32>
    %c0_3 = arith.constant 0 : index
    %c0_4 = arith.constant 0 : index
    %4 = vector.load %arg4[%c0_3, %c0_4] : memref<16x256xf32, #tpu.memory_space<vmem>>, vector<16x256xf32>
    tpu.vector_store %arg4[%c0_3, %c0_4], %3 {strides = array<i32>} : memref<16x256xf32, #tpu.memory_space<vmem>>, vector<16x256xf32>,
    return
  }
  func.func @transform_0(%arg0: i32, %arg1: i32) -> (i32, i32) {
    %c0_i32 = arith.constant 0 : i32
    %c0_i32_0 = arith.constant 0 : i32
    return %arg0, %c0_i32 : i32, i32
  }
  func.func @transform_1(%arg0: i32, %arg1: i32) -> (i32, i32) {
    %c0_i32 = arith.constant 0 : i32
    %c0_i32_0 = arith.constant 0 : i32
    return %c0_i32, %arg1 : i32, i32
  }
  func.func @transform_2(%arg0: i32, %arg1: i32) -> (i32, i32) {
    %c0_i32 = arith.constant 0 : i32
    return %arg0, %arg1 : i32, i32
  }
}

module attributes {stable_mosaic.version = 11 : i64} {
  func.func @_frft_matmul_kernel(%arg0: i32, %arg1: i32, %arg2: memref<16x128xf32, #tpu.memory_space<vmem>>, %arg3: memref<128x256xbf16, #tpu.memory_space<vmem>>, %arg4: memref<16x256xf32, #tpu.memory_space<vmem>>) attributes {dimension_semantics = [#tpu.dimension_semantics<parallel>, #tpu.dimension_semantics<parallel>], iteration_bounds = array<i64: 1, 1>, scalar_prefetch = 0 : i64, scratch_operands = 0 : i64, tpu.core_type = #tpu.core_type<tc>, window_params = [{transform_indices = @transform_0, window_bounds = array<i64: 16, 128>}, {transform_indices = @transform_1, window_bounds = array<i64: 128, 256>}, {transform_indices = @transform_2, window_bounds = array<i64: 16, 256>}]} {
    %c0 = arith.constant 0 : index
    %c0_0 = arith.constant 0 : index
    %0 = vector.load %arg2[%c0, %c0_0] : memref<16x128xf32, #tpu.memory_space<vmem>>, vector<16x128xf32>
    %1 = arith.truncf %0 : vector<16x128xf32> to vector<16x128xbf16>
    %c0_1 = arith.constant 0 : index
    %c0_2 = arith.constant 0 : index
    %2 = vector.load %arg3[%c0_1, %c0_2] : memref<128x256xbf16, #tpu.memory_space<vmem>>, vector<128x256xbf16>
    %cst = arith.constant dense<0.000000e+00> : vector<16x256xf32>
    %3 = tpu.matmul %1, %2, %cst {dimension_numbers = #tpu.dot_dimension_numbers<[1], [0], [0], [1], [0, 0, 1, 1], [], []>} : vector<16x128xbf16>, vector<128x256xbf16>, vector<16x256xf32> -> vector<16x256xf32>
    %c0_3 = arith.constant 0 : index
    %c0_4 = arith.constant 0 : index
    %4 = vector.load %arg4[%c0_3, %c0_4] : memref<16x256xf32, #tpu.memory_space<vmem>>, vector<16x256xf32>
    tpu.vector_store %arg4[%c0_3, %c0_4], %3 {strides = array<i32>} : memref<16x256xf32, #tpu.memory_space<vmem>>, vector<16x256xf32>,
    return
  }
  func.func @transform_0(%arg0: i32, %arg1: i32) -> (i32, i32) {
    %c0_i32 = arith.constant 0 : i32
    %c0_i32_0 = arith.constant 0 : i32
    return %arg0, %c0_i32 : i32, i32
  }
  func.func @transform_1(%arg0: i32, %arg1: i32) -> (i32, i32) {
    %c0_i32 = arith.constant 0 : i32
    %c0_i32_0 = arith.constant 0 : i32
    return %c0_i32, %arg1 : i32, i32
  }
  func.func @transform_2(%arg0: i32, %arg1: i32) -> (i32, i32) {
    %c0_i32 = arith.constant 0 : i32
    return %arg0, %arg1 : i32, i32
  }
}

</mosaic_0001>

<bundles_post_ra>
// kernel: tpu_custom_call.1
= control target key start
LH: loop header
LB: loop body
LE: loop exit
PB: predicated region body
PF: predicated region fallthrough
CT: control target
= control target key end

     0   :  { %7 = vsyncpa [#allocation3], 0  ;;  %s384_s0 = inlined_call_operand.hbm [shape: f32[16,128], index: 0, kind: input, shape index: {}]   ;;  %s385_s1 = inlined_call_operand.hbm [shape: bf16[128,256], index: 1, kind: input, shape index: {}]   ;;  %s386_s2 = inlined_call_operand.hbm [shape: f32[16,256], index: 2, kind: output, shape index: {}]  }
   0x1   :  { %8 = vsyncpa [#allocation6], 0 }
   0x2   :  { %9 = vsyncpa [#allocation4], 0  ;;  %s325_s9 = smov [#allocation2]   ;;  %s253_s13 = scalar_lea.hbm %s384_s0, 256 }
   0x3   :  { %s15_s10 = sshll.u32 %s325_s9, 4  ;;  %p254_p0 = scmp.ne.s32.totalorder %s384_s0, %s253_s13  ;;  %s16_s10 = int_to_ptr.vmem [resolvable:$true] %s15_s10 }
   0x4   :  { %p257_p1 = scmp.lt.u32.totalorder %s253_s13, %s384_s0 }
   0x6   :  { %p259_p2 = pnand %p257_p1, %p254_p0 }
   0x8   :  { %262 = shalt.err (!%p259_p2)
}
   0x9   :  { %s263_s18 = scalar_lea.vmem %s16_s10, 256  ;;  %p268_p4 = scmp.lt.s32.totalorder %s16_s10, %s16_s10 }
   0xa   :  { %p264_p3 = scmp.ne.s32.totalorder %s16_s10, %s263_s18  ;;  %p269_p5 = scmp.lt.s32.totalorder %s263_s18, %s263_s18 }
   0xc   :  { %p270_p6 = por %p269_p5, %p268_p4 }
   0xe   :  { %p271_p7 = pnand %p270_p6, %p264_p3 }
  0x10   :  { %274 = shalt.err (!%p271_p7)
}
  0x11   :  { %s326_s19 = smov 128   ;;  %s327_s20 = smov 8  }
  0x12   :  { %21 = dma.hbm_to_vmem [thread:$0]  %s384_s0, 256, %s16_s10, [#allocation3], %s326_s19, %s326_s19, %s327_s20  }
  0x13   :  { %s328_s23 = smov [#allocation5]   ;;  %s275_s27 = scalar_lea.hbm %s385_s1, 2048 }
  0x14   :  { %s27_s24 = sshll.u32 %s328_s23, 4  ;;  %p276_p8 = scmp.ne.s32.totalorder %s385_s1, %s275_s27  ;;  %s28_s24 = int_to_ptr.vmem [resolvable:$true] %s27_s24 }
  0x15   :  { %p279_p9 = scmp.lt.u32.totalorder %s275_s27, %s385_s1 }
  0x17   :  { %p281_p10 = pnand %p279_p9, %p276_p8 }
  0x19   :  { %284 = shalt.err (!%p281_p10)
}
  0x1a   :  { %s285_s4 = scalar_lea.vmem %s28_s24, 2048  ;;  %p290_p12 = scmp.lt.s32.totalorder %s28_s24, %s28_s24 }
  0x1b   :  { %p286_p11 = scmp.ne.s32.totalorder %s28_s24, %s285_s4  ;;  %p291_p13 = scmp.lt.s32.totalorder %s285_s4, %s285_s4 }
  0x1d   :  { %p292_p0 = por %p291_p13, %p290_p12 }
  0x1f   :  { %p293_p1 = pnand %p292_p0, %p286_p11 }
  0x21   :  { %296 = shalt.err (!%p293_p1)
}
  0x22   :  { %33 = dma.hbm_to_vmem [thread:$0]  %s385_s1, 2048, %s28_s24, [#allocation6], %s326_s19, %s326_s19, %s327_s20  }
  0x23   :  { %319 = dma.done.wait [#allocation3], 256  }
  0x24   :  { %320 = vsyncadd [#allocation3], 4294967040 }
  0x25   :  { %321 = dma.done.wait [#allocation6], 2048  }
  0x26   :  { %322 = vsyncadd [#allocation6], 4294965248  ;;  %v329_v0 = vmov 0   ;;  %v229_v1 = vld [vmem:[#allocation5 + $0x4] ss:$8 sps:$4 sm:$0xff]   ;;  %v41_v17 = vld [vmem:[#allocation2] sm:$0xff] }
  0x27   :  { %172 = vmatprep.mubr.bf16.mxu0 %v329_v0  ;;  %v231_v2 = vld [vmem:[#allocation5] ss:$8 sps:$4 sm:$0xff]   ;;  %140 = vmatprep.subr.bf16.mxu0 %v229_v1  ;;  %v232_v3 = vld [vmem:[#allocation5 + $0x14] ss:$8 sps:$4 sm:$0xff]   ;;  %v234_v4 = vld [vmem:[#allocation5 + $0x10] ss:$8 sps:$4 sm:$0xff]  }
  0x28   :  { %141 = vmatpush1.bf16.msra.mxu0 %v231_v2  ;;  %v235_v5 = vld [vmem:[#allocation5 + $0x24] ss:$8 sps:$4 sm:$0xff]   ;;  %v237_v6 = vld [vmem:[#allocation5 + $0x20] ss:$8 sps:$4 sm:$0xff]   ;;  %v238_v7 = vld [vmem:[#allocation5 + $0x34] ss:$8 sps:$4 sm:$0xff]  }
  0x29   :  { %142 = vmatprep.subr.bf16.mxu0 %v232_v3  ;;  %v240_v8 = vld [vmem:[#allocation5 + $0x30] ss:$8 sps:$4 sm:$0xff]   ;;  %v241_v9 = vld [vmem:[#allocation5 + $0x44] ss:$8 sps:$4 sm:$0xff]   ;;  %v243_v10 = vld [vmem:[#allocation5 + $0x40] ss:$8 sps:$4 sm:$0xff]  }
  0x2a   :  { %v244_v11 = vld [vmem:[#allocation5 + $0x54] ss:$8 sps:$4 sm:$0xff]   ;;  %v246_v12 = vld [vmem:[#allocation5 + $0x50] ss:$8 sps:$4 sm:$0xff]   ;;  %v247_v13 = vld [vmem:[#allocation5 + $0x64] ss:$8 sps:$4 sm:$0xff]  }
  0x2b   :  { %v249_v14 = vld [vmem:[#allocation5 + $0x60] ss:$8 sps:$4 sm:$0xff]   ;;  %v250_v15 = vld [vmem:[#allocation5 + $0x74] ss:$8 sps:$4 sm:$0xff]   ;;  %v252_v16 = vld [vmem:[#allocation5 + $0x70] ss:$8 sps:$4 sm:$0xff]  }
  0x2c   :  { %143 = vmatpush1.bf16.msra.mxu0 %v234_v4  ;;  %v42_v18 = vld [vmem:[#allocation2 + $0x8] sm:$0xff]  ;;  %s330_s1 = smov [#allocation7]  }
  0x2d   :  { %144 = vmatprep.subr.bf16.mxu0 %v235_v5  ;;  %v43_v19 = vpack.c.bf16 %v42_v18, %v41_v17  ;;  %s192_s6 = sshll.u32 %s330_s1, 4  ;;  %s193_s6 = int_to_ptr.vmem [resolvable:$true] %s192_s6 }
  0x2e   :  { %s297_s7 = scalar_lea.vmem %s193_s6, 512  ;;  %p302_p3 = scmp.lt.s32.totalorder %s193_s6, %s193_s6 }
  0x2f   :  { %p298_p2 = scmp.ne.s32.totalorder %s193_s6, %s297_s7  ;;  %p303_p4 = scmp.lt.s32.totalorder %s297_s7, %s297_s7 }
  0x30   :  { %145 = vmatpush1.bf16.msra.mxu0 %v237_v6 }
  0x31   :  { %146 = vmatprep.subr.bf16.mxu0 %v238_v7  ;;  %p304_p5 = por %p303_p4, %p302_p3 }
  0x33   :  { %p305_p6 = pnand %p304_p5, %p298_p2 }
  0x34   :  { %147 = vmatpush1.bf16.msra.mxu0 %v240_v8 }
  0x35   :  { %148 = vmatprep.subr.bf16.mxu0 %v241_v9 }
  0x38   :  { %149 = vmatpush1.bf16.msra.mxu0 %v243_v10 }
  0x39   :  { %150 = vmatprep.subr.bf16.mxu0 %v244_v11 }
  0x3c   :  { %151 = vmatpush1.bf16.msra.mxu0 %v246_v12 }
  0x3d   :  { %152 = vmatprep.subr.bf16.mxu0 %v247_v13 }
  0x40   :  { %153 = vmatpush1.bf16.msra.mxu0 %v249_v14 }
  0x41   :  { %154 = vmatprep.subr.bf16.mxu0 %v250_v15 }
  0x44   :  { %155 = vmatpush1.bf16.msra.mxu0 %v252_v16 }
  0x47   :  { %173 = vmatmul.mubr.bf16.vlgmr.msra.gmra.mrb[0].mxu0 %v43_v19 }
 0x11a   :  { %v174_v20 = vpop.f32.mrb[0].mxu0 }
 0x11b   :  { %183 = vst [vmem:[#allocation7] sm:$0xff] %v174_v20  ;;  %v176_v21 = vpop.f32.mrb[1].mxu0 }
 0x11c   :  { %184 = vst [vmem:[#allocation7 + $0x8] sm:$0xff] %v176_v21  ;;  %v178_v22 = vpop.f32.mrb[2].mxu0 }
 0x11d   :  { %185 = vst [vmem:[#allocation7 + $0x10] sm:$0xff] %v178_v22  ;;  %v180_v23 = vpop.f32.mrb[3].mxu0 }
 0x11e   :  { %186 = vst [vmem:[#allocation7 + $0x18] sm:$0xff] %v180_v23 }
 0x11f   :  { %308 = shalt.err (!%p305_p6)
}
 0x120   :  { %s309_s10 = scalar_lea.hbm %s386_s2, 512 }
 0x121   :  { %p310_p7 = scmp.ne.s32.totalorder %s386_s2, %s309_s10  ;;  %p313_p8 = scmp.lt.u32.totalorder %s309_s10, %s386_s2 }
 0x123   :  { %p315_p9 = pnand %p313_p8, %p310_p7 }
 0x125   :  { %318 = shalt.err (!%p315_p9)
}
 0x126   :  { %s331_s15 = smov 256   ;;  %s332_s16 = smov 16  }
 0x127   :  { %198 = dma.vmem_to_hbm [thread:$0]  %s193_s6, 512, %s386_s2, [#allocation4], %s331_s15, %s331_s15, %s332_s16  }
 0x128   :  { %323 = dma.done.wait [#allocation4], 512  }
 0x129   :  { %324 = vsyncadd [#allocation4], 4294966784 }
 0x12a   :  { %202 = vsyncpa [#allocation3], 1 }
 0x12b   :  { %203 = vsyncpa [#allocation6], 1 }
 0x12c   :  { %204 = vsyncpa [#allocation4], 1 }

// kernel: tpu_custom_call.1
= control target key start
LH: loop header
LB: loop body
LE: loop exit
PB: predicated region body
PF: predicated region fallthrough
CT: control target
= control target key end

     0   :  { %7 = vsyncpa [#allocation3], 0  ;;  %s384_s0 = inlined_call_operand.hbm [shape: f32[16,128], index: 0, kind: input, shape index: {}]   ;;  %s385_s1 = inlined_call_operand.hbm [shape: bf16[128,256], index: 1, kind: input, shape index: {}]   ;;  %s386_s2 = inlined_call_operand.hbm [shape: f32[16,256], index: 2, kind: output, shape index: {}]  }
   0x1   :  { %8 = vsyncpa [#allocation6], 0 }
   0x2   :  { %9 = vsyncpa [#allocation4], 0  ;;  %s325_s9 = smov [#allocation2]   ;;  %s253_s13 = scalar_lea.hbm %s384_s0, 256 }
   0x3   :  { %s15_s10 = sshll.u32 %s325_s9, 4  ;;  %p254_p0 = scmp.ne.s32.totalorder %s384_s0, %s253_s13  ;;  %s16_s10 = int_to_ptr.vmem [resolvable:$true] %s15_s10 }
   0x4   :  { %p257_p1 = scmp.lt.u32.totalorder %s253_s13, %s384_s0 }
   0x6   :  { %p259_p2 = pnand %p257_p1, %p254_p0 }
   0x8   :  { %262 = shalt.err (!%p259_p2)
}
   0x9   :  { %s263_s18 = scalar_lea.vmem %s16_s10, 256  ;;  %p268_p4 = scmp.lt.s32.totalorder %s16_s10, %s16_s10 }
   0xa   :  { %p264_p3 = scmp.ne.s32.totalorder %s16_s10, %s263_s18  ;;  %p269_p5 = scmp.lt.s32.totalorder %s263_s18, %s263_s18 }
   0xc   :  { %p270_p6 = por %p269_p5, %p268_p4 }
   0xe   :  { %p271_p7 = pnand %p270_p6, %p264_p3 }
  0x10   :  { %274 = shalt.err (!%p271_p7)
}
  0x11   :  { %s326_s19 = smov 128   ;;  %s327_s20 = smov 8  }
  0x12   :  { %21 = dma.hbm_to_vmem [thread:$0]  %s384_s0, 256, %s16_s10, [#allocation3], %s326_s19, %s326_s19, %s327_s20  }
  0x13   :  { %s328_s23 = smov [#allocation5]   ;;  %s275_s27 = scalar_lea.hbm %s385_s1, 2048 }
  0x14   :  { %s27_s24 = sshll.u32 %s328_s23, 4  ;;  %p276_p8 = scmp.ne.s32.totalorder %s385_s1, %s275_s27  ;;  %s28_s24 = int_to_ptr.vmem [resolvable:$true] %s27_s24 }
  0x15   :  { %p279_p9 = scmp.lt.u32.totalorder %s275_s27, %s385_s1 }
  0x17   :  { %p281_p10 = pnand %p279_p9, %p276_p8 }
  0x19   :  { %284 = shalt.err (!%p281_p10)
}
  0x1a   :  { %s285_s4 = scalar_lea.vmem %s28_s24, 2048  ;;  %p290_p12 = scmp.lt.s32.totalorder %s28_s24, %s28_s24 }
  0x1b   :  { %p286_p11 = scmp.ne.s32.totalorder %s28_s24, %s285_s4  ;;  %p291_p13 = scmp.lt.s32.totalorder %s285_s4, %s285_s4 }
  0x1d   :  { %p292_p0 = por %p291_p13, %p290_p12 }
  0x1f   :  { %p293_p1 = pnand %p292_p0, %p286_p11 }
  0x21   :  { %296 = shalt.err (!%p293_p1)
}
  0x22   :  { %33 = dma.hbm_to_vmem [thread:$0]  %s385_s1, 2048, %s28_s24, [#allocation6], %s326_s19, %s326_s19, %s327_s20  }
  0x23   :  { %319 = dma.done.wait [#allocation3], 256  }
  0x24   :  { %320 = vsyncadd [#allocation3], 4294967040 }
  0x25   :  { %321 = dma.done.wait [#allocation6], 2048  }
  0x26   :  { %322 = vsyncadd [#allocation6], 4294965248  ;;  %v329_v0 = vmov 0   ;;  %v229_v1 = vld [vmem:[#allocation5 + $0x4] ss:$8 sps:$4 sm:$0xff]   ;;  %v41_v17 = vld [vmem:[#allocation2] sm:$0xff] }
  0x27   :  { %172 = vmatprep.mubr.bf16.mxu0 %v329_v0  ;;  %v231_v2 = vld [vmem:[#allocation5] ss:$8 sps:$4 sm:$0xff]   ;;  %140 = vmatprep.subr.bf16.mxu0 %v229_v1  ;;  %v232_v3 = vld [vmem:[#allocation5 + $0x14] ss:$8 sps:$4 sm:$0xff]   ;;  %v234_v4 = vld [vmem:[#allocation5 + $0x10] ss:$8 sps:$4 sm:$0xff]  }
  0x28   :  { %141 = vmatpush1.bf16.msra.mxu0 %v231_v2  ;;  %v235_v5 = vld [vmem:[#allocation5 + $0x24] ss:$8 sps:$4 sm:$0xff]   ;;  %v237_v6 = vld [vmem:[#allocation5 + $0x20] ss:$8 sps:$4 sm:$0xff]   ;;  %v238_v7 = vld [vmem:[#allocation5 + $0x34] ss:$8 sps:$4 sm:$0xff]  }
  0x29   :  { %142 = vmatprep.subr.bf16.mxu0 %v232_v3  ;;  %v240_v8 = vld [vmem:[#allocation5 + $0x30] ss:$8 sps:$4 sm:$0xff]   ;;  %v241_v9 = vld [vmem:[#allocation5 + $0x44] ss:$8 sps:$4 sm:$0xff]   ;;  %v243_v10 = vld [vmem:[#allocation5 + $0x40] ss:$8 sps:$4 sm:$0xff]  }
  0x2a   :  { %v244_v11 = vld [vmem:[#allocation5 + $0x54] ss:$8 sps:$4 sm:$0xff]   ;;  %v246_v12 = vld [vmem:[#allocation5 + $0x50] ss:$8 sps:$4 sm:$0xff]   ;;  %v247_v13 = vld [vmem:[#allocation5 + $0x64] ss:$8 sps:$4 sm:$0xff]  }
  0x2b   :  { %v249_v14 = vld [vmem:[#allocation5 + $0x60] ss:$8 sps:$4 sm:$0xff]   ;;  %v250_v15 = vld [vmem:[#allocation5 + $0x74] ss:$8 sps:$4 sm:$0xff]   ;;  %v252_v16 = vld [vmem:[#allocation5 + $0x70] ss:$8 sps:$4 sm:$0xff]  }
  0x2c   :  { %143 = vmatpush1.bf16.msra.mxu0 %v234_v4  ;;  %v42_v18 = vld [vmem:[#allocation2 + $0x8] sm:$0xff]  ;;  %s330_s1 = smov [#allocation7]  }
  0x2d   :  { %144 = vmatprep.subr.bf16.mxu0 %v235_v5  ;;  %v43_v19 = vpack.c.bf16 %v42_v18, %v41_v17  ;;  %s192_s6 = sshll.u32 %s330_s1, 4  ;;  %s193_s6 = int_to_ptr.vmem [resolvable:$true] %s192_s6 }
  0x2e   :  { %s297_s7 = scalar_lea.vmem %s193_s6, 512  ;;  %p302_p3 = scmp.lt.s32.totalorder %s193_s6, %s193_s6 }
  0x2f   :  { %p298_p2 = scmp.ne.s32.totalorder %s193_s6, %s297_s7  ;;  %p303_p4 = scmp.lt.s32.totalorder %s297_s7, %s297_s7 }
  0x30   :  { %145 = vmatpush1.bf16.msra.mxu0 %v237_v6 }
  0x31   :  { %146 = vmatprep.subr.bf16.mxu0 %v238_v7  ;;  %p304_p5 = por %p303_p4, %p302_p3 }
  0x33   :  { %p305_p6 = pnand %p304_p5, %p298_p2 }
  0x34   :  { %147 = vmatpush1.bf16.msra.mxu0 %v240_v8 }
  0x35   :  { %148 = vmatprep.subr.bf16.mxu0 %v241_v9 }
  0x38   :  { %149 = vmatpush1.bf16.msra.mxu0 %v243_v10 }
  0x39   :  { %150 = vmatprep.subr.bf16.mxu0 %v244_v11 }
  0x3c   :  { %151 = vmatpush1.bf16.msra.mxu0 %v246_v12 }
  0x3d   :  { %152 = vmatprep.subr.bf16.mxu0 %v247_v13 }
  0x40   :  { %153 = vmatpush1.bf16.msra.mxu0 %v249_v14 }
  0x41   :  { %154 = vmatprep.subr.bf16.mxu0 %v250_v15 }
  0x44   :  { %155 = vmatpush1.bf16.msra.mxu0 %v252_v16 }
  0x47   :  { %173 = vmatmul.mubr.bf16.vlgmr.msra.gmra.mrb[0].mxu0 %v43_v19 }
 0x11a   :  { %v174_v20 = vpop.f32.mrb[0].mxu0 }
 0x11b   :  { %183 = vst [vmem:[#allocation7] sm:$0xff] %v174_v20  ;;  %v176_v21 = vpop.f32.mrb[1].mxu0 }
 0x11c   :  { %184 = vst [vmem:[#allocation7 + $0x8] sm:$0xff] %v176_v21  ;;  %v178_v22 = vpop.f32.mrb[2].mxu0 }
 0x11d   :  { %185 = vst [vmem:[#allocation7 + $0x10] sm:$0xff] %v178_v22  ;;  %v180_v23 = vpop.f32.mrb[3].mxu0 }
 0x11e   :  { %186 = vst [vmem:[#allocation7 + $0x18] sm:$0xff] %v180_v23 }
 0x11f   :  { %308 = shalt.err (!%p305_p6)
}
 0x120   :  { %s309_s10 = scalar_lea.hbm %s386_s2, 512 }
 0x121   :  { %p310_p7 = scmp.ne.s32.totalorder %s386_s2, %s309_s10  ;;  %p313_p8 = scmp.lt.u32.totalorder %s309_s10, %s386_s2 }
 0x123   :  { %p315_p9 = pnand %p313_p8, %p310_p7 }
 0x125   :  { %318 = shalt.err (!%p315_p9)
}
 0x126   :  { %s331_s15 = smov 256   ;;  %s332_s16 = smov 16  }
 0x127   :  { %198 = dma.vmem_to_hbm [thread:$0]  %s193_s6, 512, %s386_s2, [#allocation4], %s331_s15, %s331_s15, %s332_s16  }
 0x128   :  { %323 = dma.done.wait [#allocation4], 512  }
 0x129   :  { %324 = vsyncadd [#allocation4], 4294966784 }
 0x12a   :  { %202 = vsyncpa [#allocation3], 1 }
 0x12b   :  { %203 = vsyncpa [#allocation6], 1 }
 0x12c   :  { %204 = vsyncpa [#allocation4], 1 }

</bundles_post_ra>
